<compile_context>
chip_gen: v7x
topology: tpu7x:2x2x1
jax: 0.10.0
libtpu: 0.0.40
codegen_flags: <defaults>
</compile_context>

<pallas_src>
import jax
import jax.numpy as jnp
from jax.experimental import pallas as pl
from jax.experimental.pallas import tpu as pltpu


def _make_kernel(n_layers, hidden_activation, small_first_layer):
    """Fused kernel for `n_layers` 1x1-conv layers.

    Kernel refs: x_ref, (w_ref, b_ref) * n_layers, o_ref
      x_ref : (1, C_in, tile_p)   VMEM  (channels on sublanes, pixels on lanes)
      w_i   : (out_i, in_i)       VMEM  (torch conv weight[:, :, 0, 0], f32)
      b_i   : (out_i, 1)          VMEM  (f32)
      o_ref : (1, C_out, tile_p)  VMEM
    """

    def kernel(*refs):
        x_ref = refs[0]
        o_ref = refs[-1]
        h = x_ref[0]                                        # (C_in, tile_p), f32
        for li in range(n_layers):
            w_ref = refs[1 + 2 * li]
            b_ref = refs[2 + 2 * li]
            b = b_ref[...].astype(jnp.float32)              # (out_i, 1)
            if li == 0 and small_first_layer:
                # K <= 8: do the contraction on the (idle) VPU in f32 instead
                # of pushing mostly-padding streams through the MXU.
                w = w_ref[...].astype(jnp.float32)          # (out_0, C_in)
                acc = b                                      # (out_0, 1)
                for ci in range(w.shape[1]):
                    acc = acc + w[:, ci:ci + 1] * h[ci:ci + 1, :].astype(jnp.float32)
                h = acc                                      # (out_0, tile_p)
            else:
                # bf16 operands, f32 accumulate on the MXU.
                w = w_ref[...].astype(jnp.bfloat16)
                h = jnp.dot(w, h.astype(jnp.bfloat16),
                            preferred_element_type=jnp.float32) + b
            if li < n_layers - 1:
                if hidden_activation == "relu":
                    h = jnp.maximum(h, 0.0)
                else:  # 'tanh'
                    h = jnp.tanh(h)
            else:
                h = jnp.tanh(h)  # final Tanh, always
        o_ref[0] = h.astype(o_ref.dtype)

    return kernel


def pixel_conv_regr(x_nchw, weights, biases, *, hidden_activation="relu", tile=16384):
    """Forward pass of PixelConvRegr.

    x_nchw  : [B, C_in, H, W] float32
    weights : list of (out_i, in_i) matrices (torch conv weight[:, :, 0, 0])
    biases  : list of (out_i,) vectors
    returns : [B, C_out, H, W] float32
    """
    B, C, H, W = x_nchw.shape
    n_layers = len(weights)
    out_ch = weights[-1].shape[0]
    P = H * W

    # Free view, no transpose / pad: pixels go on the lane axis.
    x = x_nchw.reshape(B, C, P)

    # ---- pixel-tile selection with explicit VMEM budgeting -----------------
    # Per-pixel bytes: double-buffered input + output blocks plus in-kernel
    # f32/bf16 intermediates (old and new h coexist at layer boundaries).
    max_sum = max(int(w.shape[0]) + int(w.shape[1]) for w in weights)
    per_pix_bytes = 4 * (2 * C + 2 * out_ch + 2 * max_sum)
    weight_bytes = 2 * 4 * sum(int(w.size) + int(b.size)
                               for w, b in zip(weights, biases))
    block_budget = (20 << 20) - weight_bytes            # ~20 MiB for blocks
    cap_from_vmem = max(128, (max(block_budget, 0) // per_pix_bytes) // 128 * 128)
    tile_cap = max(128, min(int(tile), int(cap_from_vmem)))

    if P <= tile_cap:
        tile_p = P                                # full dim -> (8,128) exemption
    else:
        tile_p = max(128, (tile_cap // 128) * 128)  # lane-dense blocks

    # v7x: keep at least 2 programs so both TensorCores get work.
    if B * pl.cdiv(P, tile_p) < 2 and P > 256:
        half = -(-P // 2)
        tile_p = ((half + 127) // 128) * 128      # multiple of 128, < P

    grid = (B, pl.cdiv(P, tile_p))                # ragged last block is fine:
                                                  # per-pixel op, OOB writes dropped

    in_specs = [pl.BlockSpec((1, C, tile_p), lambda bi, pj: (bi, 0, pj))]
    args = [x]
    for w, b in zip(weights, biases):
        b2 = b.reshape(-1, 1)
        # Grid-invariant operands: full-array blocks with a constant index map
        # (tiny; Pallas skips re-fetching when the block index does not change).
        in_specs.append(pl.BlockSpec(w.shape, lambda bi, pj: (0, 0)))
        in_specs.append(pl.BlockSpec(b2.shape, lambda bi, pj: (0, 0)))
        args.append(w)
        args.append(b2)

    small_first_layer = (int(weights[0].shape[1]) <= 8)

    # Advisory cost estimate: tiny FLOPs, bandwidth/MXU-push dominated.
    flops = int(2 * B * P * sum(int(w.shape[0]) * int(w.shape[1]) for w in weights))
    trans_per_pix = int(weights[-1].shape[0])
    if hidden_activation == "tanh":
        trans_per_pix += sum(int(w.shape[0]) for w in weights[:-1])
    bytes_accessed = int(
        4 * (B * C * P + B * out_ch * P
             + sum(int(w.size) + int(b.size) for w, b in zip(weights, biases)))
    )
    cost = pl.CostEstimate(
        flops=flops,
        transcendentals=int(B * P * trans_per_pix),
        bytes_accessed=bytes_accessed,
    )

    out = pl.pallas_call(
        _make_kernel(n_layers, hidden_activation, small_first_layer),
        out_shape=jax.ShapeDtypeStruct((B, out_ch, P), x.dtype),
        grid=grid,
        in_specs=in_specs,
        out_specs=pl.BlockSpec((1, out_ch, tile_p), lambda bi, pj: (bi, 0, pj)),
        compiler_params=pltpu.CompilerParams(
            dimension_semantics=("parallel", "parallel"),
            vmem_limit_bytes=32 << 20),   # safe on v5e(128) / v6e(128) / v7x(64 MiB)
        cost_estimate=cost,
    )(*args)

    return out.reshape(B, out_ch, H, W)


def init_params(key, in_channels, hidden, out_channels):
    """Deterministic init matching torch Conv2d default (kaiming-uniform-ish bound)."""
    sizes_in = [in_channels] + list(hidden)
    sizes_out = list(hidden) + [out_channels]
    weights, biases = [], []
    for inch, outch in zip(sizes_in, sizes_out):
        key, kw, kb = jax.random.split(key, 3)
        bound = 1.0 / jnp.sqrt(jnp.float32(inch))
        # Native torch conv weight shape (out, in) for h <- W @ h
        w = jax.random.uniform(kw, (outch, inch), jnp.float32, -bound, bound)
        b = jax.random.uniform(kb, (outch,), jnp.float32, -bound, bound)
        weights.append(w)
        biases.append(b)
    return weights, biases


def reference_forward(x_nchw, weights, biases, hidden_activation="relu"):
    B, C, H, W = x_nchw.shape
    h = x_nchw.reshape(B, C, H * W)
    n_layers = len(weights)
    for li, (w, b) in enumerate(zip(weights, biases)):
        h = jnp.einsum("oi,bip->bop", w, h,
                       precision=jax.lax.Precision.HIGHEST) + b.reshape(1, -1, 1)
        if li < n_layers - 1:
            h = jnp.maximum(h, 0.0) if hidden_activation == "relu" else jnp.tanh(h)
        else:
            h = jnp.tanh(h)
    out_ch = weights[-1].shape[0]
    return h.reshape(B, out_ch, H, W)


if __name__ == "__main__":
    key = jax.random.PRNGKey(0)

    # ---- test 1: the canonical small shape, relu hidden ---------------------
    B, in_channels, H, W = 2, 4, 16, 16
    hidden = [32, 32]
    out_channels = 3

    key, kx = jax.random.split(key)
    x = jax.random.normal(kx, (B, in_channels, H, W), jnp.float32)
    weights, biases = init_params(key, in_channels, hidden, out_channels)

    out = pixel_conv_regr(x, weights, biases, hidden_activation="relu")
    out = jax.block_until_ready(out)
    ref = reference_forward(x, weights, biases, hidden_activation="relu")
    assert out.shape == (B, out_channels, H, W)
    # bf16 matmul operands (f32 accumulate) -> loosened tolerance vs f32 ref.
    assert jnp.allclose(out, ref, atol=5e-2, rtol=5e-2)

    # ---- test 2: ragged pixel count (P % tile_p != 0), tanh hidden ----------
    key, kx2, kp2 = jax.random.split(key, 3)
    B2, C2, H2, W2 = 1, 5, 17, 19          # P = 323 -> split into 2 blocks of 256
    hidden2, out2 = [16, 24], 2
    x2 = jax.random.normal(kx2, (B2, C2, H2, W2), jnp.float32)
    weights2, biases2 = init_params(kp2, C2, hidden2, out2)

    o2 = pixel_conv_regr(x2, weights2, biases2, hidden_activation="tanh")
    o2 = jax.block_until_ready(o2)
    r2 = reference_forward(x2, weights2, biases2, hidden_activation="tanh")
    assert o2.shape == (B2, out2, H2, W2)
    assert jnp.allclose(o2, r2, atol=5e-2, rtol=5e-2)

    print("KERNEL_OK")
</pallas_src>

<mosaic_0001>
module attributes {stable_mosaic.version = 11 : i64} {
  func.func @kernel(%arg0: i32, %arg1: i32, %arg2: memref<1x4x256xf32, #tpu.memory_space<vmem>>, %arg3: memref<32x4xf32, #tpu.memory_space<vmem>>, %arg4: memref<32x1xf32, #tpu.memory_space<vmem>>, %arg5: memref<32x32xf32, #tpu.memory_space<vmem>>, %arg6: memref<32x1xf32, #tpu.memory_space<vmem>>, %arg7: memref<3x32xf32, #tpu.memory_space<vmem>>, %arg8: memref<3x1xf32, #tpu.memory_space<vmem>>, %arg9: memref<1x3x256xf32, #tpu.memory_space<vmem>>) attributes {dimension_semantics = [#tpu.dimension_semantics<parallel>, #tpu.dimension_semantics<parallel>], iteration_bounds = array<i64: 2, 1>, scalar_prefetch = 0 : i64, scratch_operands = 0 : i64, tpu.core_type = #tpu.core_type<tc>, window_params = [{transform_indices = @transform_0, window_bounds = array<i64: 1, 4, 256>}, {pipeline_mode = #tpu.pipeline_mode<synchronous>, transform_indices = @transform_1, window_bounds = array<i64: 32, 4>}, {pipeline_mode = #tpu.pipeline_mode<synchronous>, transform_indices = @transform_2, window_bounds = array<i64: 32, 1>}, {pipeline_mode = #tpu.pipeline_mode<synchronous>, transform_indices = @transform_3, window_bounds = array<i64: 32, 32>}, {pipeline_mode = #tpu.pipeline_mode<synchronous>, transform_indices = @transform_4, window_bounds = array<i64: 32, 1>}, {pipeline_mode = #tpu.pipeline_mode<synchronous>, transform_indices = @transform_5, window_bounds = array<i64: 3, 32>}, {pipeline_mode = #tpu.pipeline_mode<synchronous>, transform_indices = @transform_6, window_bounds = array<i64: 3, 1>}, {transform_indices = @transform_7, window_bounds = array<i64: 1, 3, 256>}]} {
    %c0 = arith.constant 0 : index
    %c0_0 = arith.constant 0 : index
    %c0_1 = arith.constant 0 : index
    %0 = vector.load %arg2[%c0, %c0_0, %c0_1] : memref<1x4x256xf32, #tpu.memory_space<vmem>>, vector<1x4x256xf32>
    %1 = vector.shape_cast %0 : vector<1x4x256xf32> to vector<4x256xf32>
    %c0_2 = arith.constant 0 : index
    %c0_3 = arith.constant 0 : index
    %2 = vector.load %arg4[%c0_2, %c0_3] : memref<32x1xf32, #tpu.memory_space<vmem>>, vector<32x1xf32>
    %c0_4 = arith.constant 0 : index
    %c0_5 = arith.constant 0 : index
    %3 = vector.load %arg3[%c0_4, %c0_5] : memref<32x4xf32, #tpu.memory_space<vmem>>, vector<32x4xf32>
    %4 = vector.extract_strided_slice %3 {offsets = [0, 0], sizes = [32, 1], strides = [1, 1]} : vector<32x4xf32> to vector<32x1xf32>
    %5 = vector.extract_strided_slice %1 {offsets = [0, 0], sizes = [1, 256], strides = [1, 1]} : vector<4x256xf32> to vector<1x256xf32>
    %6 = vector.broadcast %4 : vector<32x1xf32> to vector<32x256xf32>
    %7 = vector.broadcast %5 : vector<1x256xf32> to vector<32x256xf32>
    %8 = arith.mulf %6, %7 : vector<32x256xf32>
    %9 = vector.broadcast %2 : vector<32x1xf32> to vector<32x256xf32>
    %10 = arith.addf %9, %8 : vector<32x256xf32>
    %11 = vector.extract_strided_slice %3 {offsets = [0, 1], sizes = [32, 1], strides = [1, 1]} : vector<32x4xf32> to vector<32x1xf32>
    %12 = vector.extract_strided_slice %1 {offsets = [1, 0], sizes = [1, 256], strides = [1, 1]} : vector<4x256xf32> to vector<1x256xf32>
    %13 = vector.broadcast %11 : vector<32x1xf32> to vector<32x256xf32>
    %14 = vector.broadcast %12 : vector<1x256xf32> to vector<32x256xf32>
    %15 = arith.mulf %13, %14 : vector<32x256xf32>
    %16 = arith.addf %10, %15 : vector<32x256xf32>
    %17 = vector.extract_strided_slice %3 {offsets = [0, 2], sizes = [32, 1], strides = [1, 1]} : vector<32x4xf32> to vector<32x1xf32>
    %18 = vector.extract_strided_slice %1 {offsets = [2, 0], sizes = [1, 256], strides = [1, 1]} : vector<4x256xf32> to vector<1x256xf32>
    %19 = vector.broadcast %17 : vector<32x1xf32> to vector<32x256xf32>
    %20 = vector.broadcast %18 : vector<1x256xf32> to vector<32x256xf32>
    %21 = arith.mulf %19, %20 : vector<32x256xf32>
    %22 = arith.addf %16, %21 : vector<32x256xf32>
    %23 = vector.extract_strided_slice %3 {offsets = [0, 3], sizes = [32, 1], strides = [1, 1]} : vector<32x4xf32> to vector<32x1xf32>
    %24 = vector.extract_strided_slice %1 {offsets = [3, 0], sizes = [1, 256], strides = [1, 1]} : vector<4x256xf32> to vector<1x256xf32>
    %25 = vector.broadcast %23 : vector<32x1xf32> to vector<32x256xf32>
    %26 = vector.broadcast %24 : vector<1x256xf32> to vector<32x256xf32>
    %27 = arith.mulf %25, %26 : vector<32x256xf32>
    %28 = arith.addf %22, %27 : vector<32x256xf32>
    %cst = arith.constant 0.000000e+00 : f32
    %29 = vector.broadcast %cst : f32 to vector<32x256xf32>
    %30 = arith.maximumf %28, %29 : vector<32x256xf32>
    %c0_6 = arith.constant 0 : index
    %c0_7 = arith.constant 0 : index
    %31 = vector.load %arg6[%c0_6, %c0_7] : memref<32x1xf32, #tpu.memory_space<vmem>>, vector<32x1xf32>
    %c0_8 = arith.constant 0 : index
    %c0_9 = arith.constant 0 : index
    %32 = vector.load %arg5[%c0_8, %c0_9] : memref<32x32xf32, #tpu.memory_space<vmem>>, vector<32x32xf32>
    %33 = arith.truncf %32 : vector<32x32xf32> to vector<32x32xbf16>
    %34 = arith.truncf %30 : vector<32x256xf32> to vector<32x256xbf16>
    %cst_10 = arith.constant dense<0.000000e+00> : vector<32x256xf32>
    %35 = tpu.matmul %33, %34, %cst_10 {dimension_numbers = #tpu.dot_dimension_numbers<[1], [0], [0], [1], [0, 0, 1, 1], [], []>} : vector<32x32xbf16>, vector<32x256xbf16>, vector<32x256xf32> -> vector<32x256xf32>
    %36 = vector.broadcast %31 : vector<32x1xf32> to vector<32x256xf32>
    %37 = arith.addf %35, %36 : vector<32x256xf32>
    %cst_11 = arith.constant 0.000000e+00 : f32
    %38 = vector.broadcast %cst_11 : f32 to vector<32x256xf32>
    %39 = arith.maximumf %37, %38 : vector<32x256xf32>
    %c0_12 = arith.constant 0 : index
    %c0_13 = arith.constant 0 : index
    %40 = vector.load %arg8[%c0_12, %c0_13] : memref<3x1xf32, #tpu.memory_space<vmem>>, vector<3x1xf32>
    %c0_14 = arith.constant 0 : index
    %c0_15 = arith.constant 0 : index
    %41 = vector.load %arg7[%c0_14, %c0_15] : memref<3x32xf32, #tpu.memory_space<vmem>>, vector<3x32xf32>
    %42 = arith.truncf %41 : vector<3x32xf32> to vector<3x32xbf16>
    %43 = arith.truncf %39 : vector<32x256xf32> to vector<32x256xbf16>
    %cst_16 = arith.constant dense<0.000000e+00> : vector<3x256xf32>
    %44 = tpu.matmul %42, %43, %cst_16 {dimension_numbers = #tpu.dot_dimension_numbers<[1], [0], [0], [1], [0, 0, 1, 1], [], []>} : vector<3x32xbf16>, vector<32x256xbf16>, vector<3x256xf32> -> vector<3x256xf32>
    %45 = vector.broadcast %40 : vector<3x1xf32> to vector<3x256xf32>
    %46 = arith.addf %44, %45 : vector<3x256xf32>
    %47 = math.tanh %46 : vector<3x256xf32>
    %c0_17 = arith.constant 0 : index
    %c0_18 = arith.constant 0 : index
    %c0_19 = arith.constant 0 : index
    %48 = vector.load %arg9[%c0_17, %c0_18, %c0_19] : memref<1x3x256xf32, #tpu.memory_space<vmem>>, vector<1x3x256xf32>
    %49 = vector.shape_cast %48 : vector<1x3x256xf32> to vector<3x256xf32>
    %50 = vector.shape_cast %47 : vector<3x256xf32> to vector<1x3x256xf32>
    tpu.vector_store %arg9[%c0_17, %c0_18, %c0_19], %50 {strides = array<i32>} : memref<1x3x256xf32, #tpu.memory_space<vmem>>, vector<1x3x256xf32>,
    return
  }
  func.func @transform_0(%arg0: i32, %arg1: i32) -> (i32, i32, i32) {
    %c0_i32 = arith.constant 0 : i32
    %c0_i32_0 = arith.constant 0 : i32
    return %arg0, %c0_i32, %arg1 : i32, i32, i32
  }
  func.func @transform_1(%arg0: i32, %arg1: i32) -> (i32, i32) {
    %c0_i32 = arith.constant 0 : i32
    %c0_i32_0 = arith.constant 0 : i32
    %c0_i32_1 = arith.constant 0 : i32
    return %c0_i32, %c0_i32_0 : i32, i32
  }
  func.func @transform_2(%arg0: i32, %arg1: i32) -> (i32, i32) {
    %c0_i32 = arith.constant 0 : i32
    %c0_i32_0 = arith.constant 0 : i32
    %c0_i32_1 = arith.constant 0 : i32
    return %c0_i32, %c0_i32_0 : i32, i32
  }
  func.func @transform_3(%arg0: i32, %arg1: i32) -> (i32, i32) {
    %c0_i32 = arith.constant 0 : i32
    %c0_i32_0 = arith.constant 0 : i32
    %c0_i32_1 = arith.constant 0 : i32
    return %c0_i32, %c0_i32_0 : i32, i32
  }
  func.func @transform_4(%arg0: i32, %arg1: i32) -> (i32, i32) {
    %c0_i32 = arith.constant 0 : i32
    %c0_i32_0 = arith.constant 0 : i32
    %c0_i32_1 = arith.constant 0 : i32
    return %c0_i32, %c0_i32_0 : i32, i32
  }
  func.func @transform_5(%arg0: i32, %arg1: i32) -> (i32, i32) {
    %c0_i32 = arith.constant 0 : i32
    %c0_i32_0 = arith.constant 0 : i32
    %c0_i32_1 = arith.constant 0 : i32
    return %c0_i32, %c0_i32_0 : i32, i32
  }
  func.func @transform_6(%arg0: i32, %arg1: i32) -> (i32, i32) {
    %c0_i32 = arith.constant 0 : i32
    %c0_i32_0 = arith.constant 0 : i32
    %c0_i32_1 = arith.constant 0 : i32
    return %c0_i32, %c0_i32_0 : i32, i32
  }
  func.func @transform_7(%arg0: i32, %arg1: i32) -> (i32, i32, i32) {
    %c0_i32 = arith.constant 0 : i32
    %c0_i32_0 = arith.constant 0 : i32
    return %arg0, %c0_i32, %arg1 : i32, i32, i32
  }
}

</mosaic_0001>

<bundles_post_ra>
// kernel: tpu_custom_call.1
= control target key start
LH: loop header
LB: loop body
LE: loop exit
PB: predicated region body
PF: predicated region fallthrough
CT: control target
= control target key end

     0   :  { %s943_s24 = smov 0   ;;  %s945_s25 = smov 0   ;;  %s1117_s0 = inlined_call_operand.vmem [shape: f32[2,4,256], index: 0, kind: input, shape index: {}]   ;;  %s1118_s1 = inlined_call_operand.vmem [shape: f32[32,4], index: 1, kind: input, shape index: {}]   ;;  %s1119_s2 = inlined_call_operand.vmem [shape: f32[32,1], index: 2, kind: input, shape index: {}]   ;;  %s1120_s3 = inlined_call_operand.vmem [shape: f32[32,32], index: 3, kind: input, shape index: {}]   ;;  %s1121_s4 = inlined_call_operand.vmem [shape: f32[32,1], index: 4, kind: input, shape index: {}]   ;;  %s1122_s5 = inlined_call_operand.vmem [shape: f32[3,32], index: 5, kind: input, shape index: {}]   ;;  %s1123_s6 = inlined_call_operand.vmem [shape: f32[3,1], index: 6, kind: input, shape index: {}]   ;;  %s1124_s7 = inlined_call_operand.vmem [shape: f32[2,3,256], index: 7, kind: output, shape index: {}]  }
   0x1   :  { %s947_s26 = smov 0  }
   0x2 LB: > { %s29_s27 = sadd.s32 1, %s893_s25  ;;  %p817_p0 = scmp.ge.s32.totalorder %s897_s26, 1  ;;  %s897_s26 = sphi %s947_s26, %s17_s26   ;;  %s893_s25 = sphi %s945_s25, %s1126_s25   ;;  %s889_s24 = sphi %s943_s24, %s1125_s24  }
   0x3   : > { %p31_p1 = scmp.ge.s32.totalorder %s29_s27, 2  ;;  %p258_p2 = scmp.lt.s32.totalorder %s897_s26, 3 }
   0x5   : > { %s1128_s27 = smov (%p31_p1, %s29_s27), 0  ;;  %p259_p3 = pnand %p817_p0, %p258_p2 }
   0x6   : > { %v324_v0 = vld [vmem:[%s1118_s1] sm:$0xff] (!%p259_p3)  ;;  %v899_v2 = vmov (!%p259_p3), 0   ;;  %v325_v3 = vld [vmem:[%s1118_s1 + $0x8] sm:$0xff] (!%p259_p3)  ;;  %v327_v5 = vld [vmem:[%s1118_s1 + $0x18] sm:$0xff] (!%p259_p3)  ;;  %v900_v6 = vmov (!%p259_p3), 1   ;;  %v901_v9 = vmov (!%p259_p3), 2   ;;  %v349_v21 = vlaneseq (!%p259_p3) }
   0x7   : > { %262 = sbr.rel (%p259_p3) target bundleno = 662 (0x296), region = 48  ;;  %v320_v1 = vld [vmem:[%s1119_s2] sm:$0xff] (!%p259_p3)  ;;  %858 = vset.pattern.permute.xlu1 (!%p259_p3), %v899_v2  ;;  %857 = vset.pattern.permute.xlu0 (!%p259_p3), %v899_v2  ;;  %v321_v4 = vld [vmem:[%s1119_s2 + $0x8] sm:$0xff] (!%p259_p3)  ;;  %v322_v7 = vld [vmem:[%s1119_s2 + $0x10] sm:$0xff] (!%p259_p3)  ;;  %v902_v10 = vmov (!%p259_p3), 3   ;;  %p299_p4 = scmp.lt.s32.totalorder (!%p259_p3), %s889_s24, 1 }
   0x8   : > { %330 = vperm.xlu0 (!%p259_p3), %857, %v324_v0   ;;  %377 = vperm.xlu1 (!%p259_p3), %858, %v320_v1   ;;  %v326_v8 = vld [vmem:[%s1118_s1 + $0x10] sm:$0xff] (!%p259_p3)  ;;  %v323_v11 = vld [vmem:[%s1119_s2 + $0x18] sm:$0xff] (!%p259_p3)  ;;  %v562_v12 = vld [vmem:[%s1121_s4 + $0x8] sm:$0xff] (!%p259_p3)  ;;  %v350_v24 = vshrl.u32 (!%p259_p3), %v349_v21, 7  ;;  %vm595_vm0 = vcmask (!%p259_p3), 261120  }
   0x9   : > { %634 = vmatprep.mubr.bf16.mxu0 (!%p259_p3), %v899_v2  ;;  %710 = vmatprep.mubr.bf16.mxu1 (!%p259_p3), %v899_v2  ;;  %v561_v13 = vld [vmem:[%s1121_s4] sm:$0xff] (!%p259_p3)  ;;  %v563_v14 = vld [vmem:[%s1121_s4 + $0x10] sm:$0xff] (!%p259_p3)  ;;  %v564_v15 = vld [vmem:[%s1121_s4 + $0x18] sm:$0xff] (!%p259_p3) }
   0xa   : > { %v663_v16 = vld [vmem:[%s1123_s6] sm:$0x7] (!%p259_p3)  ;;  %v351_v27 = vsub.s32 (!%p259_p3), 0, %v350_v24  ;;  %v355_v28 = vsub.s32 (!%p259_p3), 4, %v350_v24  ;;  %v421_v30 = vsub.s32 (!%p259_p3), 1, %v350_v24  ;;  %v425_v31 = vsub.s32 (!%p259_p3), 5, %v350_v24 }
   0xb   : > { %v471_v38 = vsub.s32 (!%p259_p3), 2, %v350_v24  ;;  %v475_v39 = vsub.s32 (!%p259_p3), 6, %v350_v24  ;;  %v521_v40 = vsub.s32 (!%p259_p3), 3, %v350_v24  ;;  %v525_v41 = vsub.s32 (!%p259_p3), 7, %v350_v24 }
   0xc   : > { %335 = vperm.xlu0 (!%p259_p3), %857, %v325_v3   ;;  %382 = vperm.xlu1 (!%p259_p3), %858, %v321_v4  }
   0xe   : > { %s1130_s24 = smov (!%p299_p4, %s889_s24), 1 }
   0xf   : > { %s827_s12 = sshll.u32 %s1130_s24, 3 }
  0x10   : > { %345 = vperm.xlu0 %857, %v327_v5   ;;  %859 = vset.pattern.permute.xlu1 %v900_v6  ;;  %s306_s15 = scalar_lea.vmem %s1117_s0, %s827_s12  ;;  %s316_s9 = scalar_lea.vmem %s1124_s7, %s827_s12 }
  0x11   : > { %408 = vperm.xlu1 %859, %v325_v3   ;;  %v319_v29 = vld [vmem:[%s306_s15] sm:$0xff] }
  0x12   : > { %v352_v33 = vrot.slane %v319_v29, %v351_v27  ;;  %v356_v34 = vrot.slane %v319_v29, %v355_v28  ;;  %v422_v36 = vrot.slane %v319_v29, %v421_v30  ;;  %v426_v37 = vrot.slane %v319_v29, %v425_v31 }
  0x13   : > { %v472_v47 = vrot.slane %v319_v29, %v471_v38  ;;  %v476_v48 = vrot.slane %v319_v29, %v475_v39  ;;  %v522_v50 = vrot.slane %v319_v29, %v521_v40  ;;  %v526_v51 = vrot.slane %v319_v29, %v525_v41 }
  0x14   : > { %387 = vperm.xlu0 %857, %v322_v7   ;;  %v1026_v43 = vrot.slane %v352_v33, %v351_v27  ;;  %v1028_v44 = vrot.slane %v356_v34, %v351_v27  ;;  %v1030_v45 = vrot.slane %v422_v36, %v421_v30  ;;  %v1032_v46 = vrot.slane %v426_v37, %v421_v30 }
  0x15   : > { %860 = vset.pattern.permute.xlu1 %v899_v2  ;;  %v1042_v59 = vrot.slane %v472_v47, %v471_v38  ;;  %v1044_v60 = vrot.slane %v476_v48, %v471_v38  ;;  %v1048_v63 = vrot.slane %v522_v50, %v521_v40 }
  0x16   : > { %340 = vperm.xlu1 %860, %v326_v8  }
  0x18   : > { %862 = vset.pattern.permute.xlu0 %v900_v6 }
  0x19   : > { %404 = vperm.xlu0 %862, %v324_v0  }
  0x1a   : > { %861 = vset.pattern.permute.xlu1 %v901_v9 }
  0x1b   : > { %454 = vperm.xlu1 %861, %v324_v0  }
  0x1d   : > { %412 = vperm.xlu0 %862, %v326_v8  }
  0x1f   : > { %458 = vperm.xlu1 %861, %v325_v3  }
  0x21   : > { %866 = vset.pattern.permute.xlu0 %v902_v10 }
  0x22   : > { %508 = vperm.xlu0 %866, %v325_v3  }
  0x23   : > { %863 = vset.pattern.permute.xlu1 %v899_v2 }
  0x24   : > { %392 = vperm.xlu1 %863, %v323_v11  }
  0x26   : > { %512 = vperm.xlu0 %866, %v326_v8  }
  0x28   : > { %864 = vset.pattern.permute.xlu1 %v900_v6 }
  0x29   : > { %416 = vperm.xlu1 %864, %v327_v5  }
  0x2a   : > { %869 = vset.pattern.permute.xlu0 %v899_v2 }
  0x2b   : > { %577 = vperm.xlu0 %869, %v561_v13  }
  0x2d   : > { %865 = vset.pattern.permute.xlu1 %v902_v10 }
  0x2e   : > { %504 = vperm.xlu1 %865, %v324_v0   ;;  %v1050_v0 = vrot.slane %v526_v51, %v521_v40 }
  0x2f   : > { %592 = vperm.xlu0 %869, %v564_v15  }
  0x32   : > { %867 = vset.pattern.permute.xlu1 %v901_v9 }
  0x33   : > { %462 = vperm.xlu1 %867, %v326_v8  }
  0x37   : > { %466 = vperm.xlu1 %867, %v327_v5  }
  0x3b   : > { %868 = vset.pattern.permute.xlu1 %v902_v10 }
  0x3c   : > { %516 = vperm.xlu1 %868, %v327_v5  }
  0x40   : > { %870 = vset.pattern.permute.xlu1 %v899_v2 }
  0x41   : > { %582 = vperm.xlu1 %870, %v562_v12  }
  0x45   : > { %587 = vperm.xlu1 %870, %v563_v14  }
  0x49   : > { %672 = vperm.xlu1 %870, %v663_v16  }
  0x87   : > { %v331_v17 = vpop.permute.xlu0 %330  ;;  %v378_v18 = vpop.permute.xlu1 %377 }
  0x88   : > { %v367_v54 = vmul.f32 %v1026_v43, %v331_v17  ;;  %v368_v55 = vmul.f32 %v1028_v44, %v331_v17 }
  0x8a   : > { %v395_v6 = vadd.f32 %v378_v18, %v367_v54  ;;  %v396_v7 = vadd.f32 %v378_v18, %v368_v55 }
  0x8b   : > { %v336_v19 = vpop.permute.xlu0 %335  ;;  %v383_v20 = vpop.permute.xlu1 %382 }
  0x8c   : > { %v369_v52 = vmul.f32 %v1026_v43, %v336_v19  ;;  %v370_v53 = vmul.f32 %v1028_v44, %v336_v19 }
  0x8e   : > { %v397_v1 = vadd.f32 %v383_v20, %v369_v52  ;;  %v398_v3 = vadd.f32 %v383_v20, %v370_v53 }
  0x8f   : > { %v1014_v22 = vpop.permute.xlu0 %345 }
  0x90   : > { %v409_v23 = vpop.permute.xlu1 %408  ;;  %v374_v54 = vmul.f32 %v1028_v44, %v1014_v22 }
  0x91   : > { %v439_v57 = vmul.f32 %v1030_v45, %v409_v23  ;;  %v440_v58 = vmul.f32 %v1032_v46, %v409_v23 }
  0x93   : > { %v1022_v25 = vpop.permute.xlu0 %387  ;;  %v447_v9 = vadd.f32 %v439_v57, %v397_v1  ;;  %v448_v10 = vadd.f32 %v440_v58, %v398_v3 }
  0x95   : > { %v1024_v26 = vpop.permute.xlu1 %340 }
  0x96   : > { %v371_v30 = vmul.f32 %v1026_v43, %v1024_v26  ;;  %v372_v31 = vmul.f32 %v1028_v44, %v1024_v26 }
  0x98   : > { %v405_v35 = vpop.permute.xlu0 %404  ;;  %v399_v41 = vadd.f32 %v1022_v25, %v371_v30 }
  0x99   : > { %v437_v61 = vmul.f32 %v1030_v45, %v405_v35  ;;  %v438_v62 = vmul.f32 %v1032_v46, %v405_v35 }
  0x9a   : > { %v455_v32 = vpop.permute.xlu1 %454 }
  0x9b   : > { %v445_v12 = vadd.f32 %v437_v61, %v395_v6  ;;  %v446_v13 = vadd.f32 %v438_v62, %v396_v7  ;;  %v487_v14 = vmul.f32 %v1042_v59, %v455_v32  ;;  %v488_v15 = vmul.f32 %v1044_v60, %v455_v32 }
  0x9c   : > { %v413_v49 = vpop.permute.xlu0 %412 }
  0x9d   : > { %v495_v21 = vadd.f32 %v487_v14, %v445_v12  ;;  %v496_v23 = vadd.f32 %v488_v15, %v446_v13  ;;  %v441_v34 = vmul.f32 %v1030_v45, %v413_v49  ;;  %v442_v35 = vmul.f32 %v1032_v46, %v413_v49 }
  0x9e   : > { %v459_v42 = vpop.permute.xlu1 %458  ;;  %v373_v49 = vmul.f32 %v1026_v43, %v1014_v22 }
  0x9f   : > { %v489_v4 = vmul.f32 %v1042_v59, %v459_v42  ;;  %v490_v5 = vmul.f32 %v1044_v60, %v459_v42  ;;  %v400_v42 = vadd.f32 %v1022_v25, %v372_v31  ;;  %v449_v52 = vadd.f32 %v441_v34, %v399_v41 }
  0xa1   : > { %v509_v8 = vpop.permute.xlu0 %508  ;;  %v497_v16 = vadd.f32 %v489_v4, %v447_v9  ;;  %v498_v17 = vadd.f32 %v490_v5, %v448_v10  ;;  %v450_v53 = vadd.f32 %v442_v35, %v400_v42 }
  0xa2   : > { %v539_v19 = vmul.f32 %v1048_v63, %v509_v8  ;;  %v540_v20 = vmul.f32 %v1050_v0, %v509_v8 }
  0xa3   : > { %v1038_v56 = vpop.permute.xlu1 %392 }
  0xa4   : > { %v547_v18 = vadd.f32 %v539_v19, %v497_v16  ;;  %v548_v29 = vadd.f32 %v540_v20, %v498_v17  ;;  %v401_v3 = vadd.f32 %v1038_v56, %v373_v49  ;;  %v402_v43 = vadd.f32 %v1038_v56, %v374_v54  ;;  %v568_v19 = vld [vmem:[%s1120_s3 + $0x18] sm:$0xff] }
  0xa5   : > { %v513_v26 = vpop.permute.xlu0 %512 }
  0xa6   : > { %v556_v38 = vmax.f32 %v548_v29, 0.0  ;;  %v555_v40 = vmax.f32 %v547_v18, 0.0  ;;  %v541_v62 = vmul.f32 %v1048_v63, %v513_v26  ;;  %v542_v1 = vmul.f32 %v1050_v0, %v513_v26 }
  0xa8   : > { %v417_v11 = vpop.permute.xlu1 %416 }
  0xa9   : > { %v443_v55 = vmul.f32 %v1030_v45, %v417_v11  ;;  %v444_v57 = vmul.f32 %v1032_v46, %v417_v11 }
  0xab   : > { %v451_v44 = vadd.f32 %v443_v55, %v401_v3  ;;  %v452_v45 = vadd.f32 %v444_v57, %v402_v43  ;;  %v664_v57 = vld [vmem:[%s1122_s5] sm:$0x7] }
  0xad   : > { %v505_v24 = vpop.permute.xlu1 %504 }
  0xae   : > { %v537_v27 = vmul.f32 %v1048_v63, %v505_v24  ;;  %v538_v28 = vmul.f32 %v1050_v0, %v505_v24 }
  0xb0   : > { %v545_v32 = vadd.f32 %v537_v27, %v495_v21  ;;  %v546_v33 = vadd.f32 %v538_v28, %v496_v23  ;;  %v578_v21 = vpop.permute.xlu0 %577 }
  0xb2   : > { %v463_v36 = vpop.permute.xlu1 %462  ;;  %v554_v37 = vmax.f32 %v546_v33, 0.0  ;;  %v553_v39 = vmax.f32 %v545_v32, 0.0 }
  0xb3   : > { %v491_v47 = vmul.f32 %v1042_v59, %v463_v36  ;;  %v492_v48 = vmul.f32 %v1044_v60, %v463_v36 }
  0xb4   : > { %v572_v50 = vpack.c.bf16 %v556_v38, %v554_v37  ;;  %v571_v51 = vpack.c.bf16 %v555_v40, %v553_v39  ;;  %v593_v42 = vpop.permute.xlu0 %592 }
  0xb5   : > { %v499_v58 = vadd.f32 %v491_v47, %v449_v52  ;;  %v500_v61 = vadd.f32 %v492_v48, %v450_v53 }
  0xb6   : > { %v467_v25 = vpop.permute.xlu1 %466  ;;  %602 = vmatprep.subr.bf16.mxu0 %v572_v50 }
  0xb7   : > { %603 = vmatpush1.bf16.msra.mxu0 %v571_v51  ;;  %v493_v4 = vmul.f32 %v1042_v59, %v467_v25  ;;  %v494_v22 = vmul.f32 %v1044_v60, %v467_v25  ;;  %v549_v46 = vadd.f32 %v541_v62, %v499_v58  ;;  %v550_v5 = vadd.f32 %v542_v1, %v500_v61  ;;  %v565_v59 = vld [vmem:[%s1120_s3] sm:$0xff]  ;;  %v566_v60 = vld [vmem:[%s1120_s3 + $0x8] sm:$0xff] }
  0xb8   : > { %v665_v58 = vpack.c.bf16 %v664_v57, %v664_v57 }
  0xb9   : > { %v501_v7 = vadd.f32 %v493_v4, %v451_v44  ;;  %v502_v8 = vadd.f32 %v494_v22, %v452_v45  ;;  %v557_v13 = vmax.f32 %v549_v46, 0.0  ;;  %v558_v14 = vmax.f32 %v550_v5, 0.0 }
  0xbb   : > { %v517_v6 = vpop.permute.xlu1 %516 }
  0xbc   : > { %v543_v9 = vmul.f32 %v1048_v63, %v517_v6  ;;  %v544_v10 = vmul.f32 %v1050_v0, %v517_v6  ;;  %v569_v63 = vpack.c.bf16 %v566_v60, %v565_v59  ;;  %v567_v0 = vld [vmem:[%s1120_s3 + $0x10] sm:$0xff] }
  0xbd   : > { %v570_v20 = vpack.c.bf16 %v568_v19, %v567_v0 }
  0xbe   : > { %v551_v11 = vadd.f32 %v543_v9, %v501_v7  ;;  %v552_v12 = vadd.f32 %v544_v10, %v502_v8 }
  0xc0   : > { %v559_v56 = vmax.f32 %v551_v11, 0.0  ;;  %v560_v15 = vmax.f32 %v552_v12, 0.0  ;;  %v583_v27 = vpop.permute.xlu1 %582 }
  0xc2   : > { %v574_v16 = vpack.c.bf16 %v560_v15, %v558_v14  ;;  %v573_v17 = vpack.c.bf16 %v559_v56, %v557_v13 }
  0xc4   : > { %604 = vmatprep.subr.bf16.mxu0 %v574_v16  ;;  %v588_v37 = vpop.permute.xlu1 %587 }
  0xc5   : > { %605 = vmatpush1.bf16.msra.mxu0 %v573_v17 }
  0xc8   : > { %822 = vmatmul.mubr.msk.bf16.vlgmr.msra.gmra.mrb[0].mxu0 %vm595_vm0, %v569_v63  ;;  %v673_v61 = vpop.permute.xlu1 %672 }
  0xc9   : > { %644 = vmatprep.mubr.bf16.mxu0 %v899_v2 }
  0xd0   : > { %823 = vmatmul.mubr.msk.bf16.gmra.mrb[4].mxu0 %vm595_vm0, %v570_v20 }
 0x19b   : > { %v636_v23 = vpop.f32.mrb[0].mxu0 }
 0x19c   : > { %v637_v24 = vadd.f32 %v636_v23, %v578_v21  ;;  %v638_v18 = vpop.f32.mrb[1].mxu0 }
 0x19d   : > { %v639_v28 = vadd.f32 %v638_v18, %v578_v21  ;;  %v640_v29 = vpop.f32.mrb[2].mxu0 }
 0x19e   : > { %v641_v30 = vadd.f32 %v640_v29, %v583_v27  ;;  %v642_v2 = vpop.f32.mrb[3].mxu0  ;;  %v655_v32 = vmax.f32 %v637_v24, 0.0 }
 0x19f   : > { %v643_v31 = vadd.f32 %v642_v2, %v583_v27  ;;  %v656_v34 = vmax.f32 %v639_v28, 0.0 }
 0x1a0   : > { %v657_v33 = vmax.f32 %v641_v30, 0.0 }
 0x1a1   : > { %v658_v35 = vmax.f32 %v643_v31, 0.0 }
 0x1a2   : > { %v666_v36 = vpack.c.bf16 %v657_v33, %v655_v32 }
 0x1a3   : > { %v646_v38 = vpop.f32.mrb[4].mxu0  ;;  %v667_v39 = vpack.c.bf16 %v658_v35, %v656_v34 }
 0x1a4   : > { %v647_v40 = vadd.f32 %v646_v38, %v588_v37  ;;  %v648_v41 = vpop.f32.mrb[5].mxu0 }
 0x1a5   : > { %v649_v47 = vadd.f32 %v648_v41, %v588_v37  ;;  %v650_v48 = vpop.f32.mrb[6].mxu0  ;;  %678 = vmatprep.subr.bf16.mxu1 %v667_v39 }
 0x1a6   : > { %v651_v26 = vadd.f32 %v650_v48, %v593_v42  ;;  %v652_v50 = vpop.f32.mrb[7].mxu0  ;;  %679 = vmatpush1.bf16.msra.mxu1 %v666_v36  ;;  %v659_v52 = vmax.f32 %v647_v40, 0.0 }
 0x1a7   : > { %v653_v51 = vadd.f32 %v652_v50, %v593_v42  ;;  %v660_v49 = vmax.f32 %v649_v47, 0.0 }
 0x1a8   : > { %v661_v53 = vmax.f32 %v651_v26, 0.0 }
 0x1a9   : > { %v662_v54 = vmax.f32 %v653_v51, 0.0 }
 0x1aa   : > { %v668_v55 = vpack.c.bf16 %v661_v53, %v659_v52 }
 0x1ab   : > { %v669_v25 = vpack.c.bf16 %v662_v54, %v660_v49 }
 0x1ad   : > { %680 = vmatprep.subr.bf16.mxu1 %v669_v25 }
 0x1ae   : > { %681 = vmatpush1.bf16.msra.mxu1 %v668_v55 }
 0x1b1   : > { %824 = vmatmul.mubr.msk.bf16.vlgmr.msra.gmra.mrb[0].mxu1 %vm595_vm0, %v665_v58 }
 0x284   : > { %v712_v62 = vpop.f32.mrb[0].mxu1 }
 0x285   : > { %v713_v1 = vadd.f32 %v712_v62, %v673_v61  ;;  %v714_v3 = vpop.f32.mrb[1].mxu1 }
 0x286   : > { %v715_v43 = vadd.f32 %v714_v3, %v673_v61  ;;  %v716_v4 = vpop.f32.mrb[2].mxu1 }
 0x287   : > { %871 = vtanh.f32 %v713_v1  ;;  %v717_v22 = vpop.f32.mrb[3].mxu1 }
 0x288   : > { %873 = vtanh.f32 %v715_v43 }
 0x291   : > { %v872_v44 = vpop.eup %871 }
 0x292   : > { %v874_v45 = vpop.eup %873 }
 0x293   : > { %v723_v46 = vcombine.low %v872_v44, %v874_v45 }
 0x295   : > { %725 = vst [vmem:[%s316_s9] sm:$0x77] %v723_v46 }
 0x296 PF: > { %s17_s26 = sadd.s32 1, %s897_s26   ;;  %s1125_s24 = smov %s893_s25 }
 0x297   : > { %p14_p5 = scmp.ge.s32.totalorder %s17_s26, 4   ;;  %s1126_s25 = smov %s1128_s27 }
 0x299   :  { %16 = sbr.rel (!%p14_p5) target bundleno = 2 (0x2), region = 78 }

</bundles_post_ra>
